<compile_context>
chip_gen: v7x
topology: tpu7x:2x2x1
jax: 0.10.0
libtpu: 0.0.40
codegen_flags: <defaults>
</compile_context>

<pallas_src>
import jax
import jax.numpy as jnp
from jax.experimental import pallas as pl
from jax.experimental.pallas import tpu as pltpu


def _disc_kernel(state_ref, action_ref, w1s_ref, w1a_ref, b1_ref, w2_ref,
                 b2_ref, out_ref):
    """One batch tile: split matmul -> bias -> relu -> row contraction -> bias -> sigmoid."""
    # Layer 1 on the MXU.  Splitting W1 makes the concat unnecessary:
    #   cat([s, a]) @ W1  ==  s @ W1[:S] + a @ W1[S:]
    # Inputs may be bf16; accumulation is f32 via preferred_element_type.
    h = jnp.dot(state_ref[...], w1s_ref[...], preferred_element_type=jnp.float32)
    h = h + jnp.dot(action_ref[...], w1a_ref[...], preferred_element_type=jnp.float32)
    h = jnp.maximum(h + b1_ref[...], 0.0)                       # (tile_b, 128) VPU

    # Layer 2 (128 -> 1), produced lane-dense as a (1, tile_b) row:
    # contract the 128-axis of w2_row (1,128) against the 128-axis of h.
    z = jax.lax.dot_general(w2_ref[...], h, (((1,), (1,)), ((), ())),
                            preferred_element_type=jnp.float32)  # (1, tile_b)
    z = z + b2_ref[0]                                            # scalar bias from SMEM
    out_ref[...] = jax.nn.sigmoid(z)                             # EUP exp + VPU


def _round_up(x, m):
    return ((x + m - 1) // m) * m


def _choose_tile(B, tile_b):
    """Batch tile: one block for small B, else >=2 balanced 8-aligned tiles."""
    if B <= 512:
        return B
    half = _round_up(-(-B // 2), 8)          # ceil(B/2), 8-aligned -> >=2 tiles (v7x: 2 TCs)
    return min(_round_up(tile_b, 8), half)


def discriminator_forward(state, action, params, *, tile_b=2048):
    """state: (B, state_dim), action: (B, action_dim) -> (B, 1) probabilities.

    params = (w1_s, w1_a, b1, w2_row, b2) with
      w1_s: (state_dim, 128), w1_a: (action_dim, 128), b1: (1, 128),
      w2_row: (1, 128), b2: (1,)
    Inputs are consumed in their native dtype (f32 or bf16); matmul accumulates f32.
    """
    w1s, w1a, b1, w2_row, b2 = (p.astype(jnp.float32) for p in params)

    B, S = state.shape
    A = action.shape[1]
    H = b1.shape[-1]

    tb = _choose_tile(B, tile_b)
    num_tiles = pl.cdiv(B, tb)

    # Advisory cost hint so XLA's scheduler can overlap this call.
    in_bytes = (state.size * state.dtype.itemsize
                + action.size * action.dtype.itemsize)
    w_bytes = 4 * int(w1s.size + w1a.size + b1.size + w2_row.size + b2.size)
    cost = pl.CostEstimate(
        flops=2 * B * (S + A) * H + 2 * B * H,
        transcendentals=B,
        bytes_accessed=in_bytes + w_bytes + B * 4,
    )

    out = pl.pallas_call(
        _disc_kernel,
        out_shape=jax.ShapeDtypeStruct((num_tiles, tb), jnp.float32),
        grid=(num_tiles,),
        in_specs=[
            pl.BlockSpec((tb, S), lambda i: (i, 0)),    # state tile (native dtype)
            pl.BlockSpec((tb, A), lambda i: (i, 0)),    # action tile (native dtype)
            pl.BlockSpec((S, H), lambda i: (0, 0)),     # W1[:S]  (resident)
            pl.BlockSpec((A, H), lambda i: (0, 0)),     # W1[S:]  (resident)
            pl.BlockSpec((1, H), lambda i: (0, 0)),     # b1      (resident)
            pl.BlockSpec((1, H), lambda i: (0, 0)),     # W2 row  (resident)
            pl.BlockSpec(memory_space=pltpu.SMEM),      # b2 scalar, (1,)
        ],
        # Lane-dense output: each grid step writes one (1, tile_b) row.
        out_specs=pl.BlockSpec((1, tb), lambda i: (i, 0)),
        compiler_params=pltpu.CompilerParams(
            dimension_semantics=("parallel",)),
        cost_estimate=cost,
    )(state, action, w1s, w1a, b1, w2_row, b2)

    # (num_tiles, tb) -> (B, 1); rows past B (partial last tile) are discarded.
    return out.reshape(num_tiles * tb)[:B].reshape(B, 1)


def init_params(key, state_dim, action_dim, hidden=128):
    """Deterministic init mimicking nn.Linear's U(-1/sqrt(fan_in), 1/sqrt(fan_in)).

    W1 is stored pre-split (state rows / action rows) so the forward pass never
    has to concatenate [state, action]; W2 is stored as a (1, hidden) row; b2 is (1,).
    """
    in_dim = state_dim + action_dim
    k1, k2, k3, k4 = jax.random.split(key, 4)
    lim1 = 1.0 / jnp.sqrt(jnp.float32(in_dim))
    lim2 = 1.0 / jnp.sqrt(jnp.float32(hidden))
    # stored as (in, out): x @ W  ==  torch's  x @ W_t^T
    w1 = jax.random.uniform(k1, (in_dim, hidden), jnp.float32, -lim1, lim1)
    b1 = jax.random.uniform(k2, (1, hidden), jnp.float32, -lim1, lim1)
    w2 = jax.random.uniform(k3, (hidden, 1), jnp.float32, -lim2, lim2)
    b2 = jax.random.uniform(k4, (1,), jnp.float32, -lim2, lim2)
    w1_s, w1_a = w1[:state_dim], w1[state_dim:]
    w2_row = w2.reshape(1, hidden)
    return (w1_s, w1_a, b1, w2_row, b2)


def _reference(state, action, params):
    """Torch-equivalent math: concat + two dense layers + sigmoid (f32)."""
    w1_s, w1_a, b1, w2_row, b2 = params
    w1 = jnp.concatenate([w1_s, w1_a], axis=0)        # (S+A, 128)
    sa = jnp.concatenate([state.astype(jnp.float32),
                          action.astype(jnp.float32)], axis=1)
    h = jnp.maximum(sa @ w1 + b1, 0.0)
    return jax.nn.sigmoid(h @ w2_row.T + b2)


if __name__ == "__main__":
    key = jax.random.PRNGKey(0)
    k_s, k_a, k_p = jax.random.split(key, 3)

    # Small shapes consistent with the module.
    batch, state_dim, action_dim = 8, 16, 8
    state = jax.random.normal(k_s, (batch, state_dim), jnp.float32)
    action = jax.random.normal(k_a, (batch, action_dim), jnp.float32)
    params = init_params(k_p, state_dim, action_dim)

    # f32 path (matches the PyTorch reference numerics).
    out = jax.block_until_ready(discriminator_forward(state, action, params))
    ref = _reference(state, action, params)
    assert out.shape == (batch, 1), out.shape
    assert jnp.allclose(out, ref, atol=1e-5, rtol=1e-5), "mismatch vs JAX reference (f32)"

    # bf16 input path (halved HBM traffic); looser tolerance for input rounding.
    out_bf = jax.block_until_ready(discriminator_forward(
        state.astype(jnp.bfloat16), action.astype(jnp.bfloat16), params))
    ref_bf = _reference(state.astype(jnp.bfloat16), action.astype(jnp.bfloat16), params)
    assert out_bf.shape == (batch, 1)
    assert jnp.allclose(out_bf, ref_bf, atol=2e-2, rtol=2e-2), "mismatch vs reference (bf16)"

    # Multi-tile / partial-last-tile path (exercises the lane-dense output layout).
    B2 = 600
    k_s2, k_a2 = jax.random.split(jax.random.PRNGKey(1), 2)
    state2 = jax.random.normal(k_s2, (B2, state_dim), jnp.float32)
    action2 = jax.random.normal(k_a2, (B2, action_dim), jnp.float32)
    out2 = jax.block_until_ready(discriminator_forward(state2, action2, params))
    ref2 = _reference(state2, action2, params)
    assert out2.shape == (B2, 1)
    assert jnp.allclose(out2, ref2, atol=1e-5, rtol=1e-5), "mismatch vs reference (multi-tile)"

    print("KERNEL_OK")
</pallas_src>

<mosaic_0001>
module attributes {stable_mosaic.version = 11 : i64} {
  func.func @_disc_kernel(%arg0: i32, %arg1: memref<8x16xf32, #tpu.memory_space<vmem>>, %arg2: memref<8x8xf32, #tpu.memory_space<vmem>>, %arg3: memref<16x128xf32, #tpu.memory_space<vmem>>, %arg4: memref<8x128xf32, #tpu.memory_space<vmem>>, %arg5: memref<1x128xf32, #tpu.memory_space<vmem>>, %arg6: memref<1x128xf32, #tpu.memory_space<vmem>>, %arg7: memref<1xf32, #tpu.memory_space<smem>>, %arg8: memref<1x8xf32, #tpu.memory_space<vmem>>) attributes {dimension_semantics = [#tpu.dimension_semantics<parallel>], iteration_bounds = array<i64: 1>, scalar_prefetch = 0 : i64, scratch_operands = 0 : i64, tpu.core_type = #tpu.core_type<tc>, window_params = [{transform_indices = @transform_0, window_bounds = array<i64: 8, 16>}, {transform_indices = @transform_1, window_bounds = array<i64: 8, 8>}, {pipeline_mode = #tpu.pipeline_mode<synchronous>, transform_indices = @transform_2, window_bounds = array<i64: 16, 128>}, {pipeline_mode = #tpu.pipeline_mode<synchronous>, transform_indices = @transform_3, window_bounds = array<i64: 8, 128>}, {pipeline_mode = #tpu.pipeline_mode<synchronous>, transform_indices = @transform_4, window_bounds = array<i64: 1, 128>}, {pipeline_mode = #tpu.pipeline_mode<synchronous>, transform_indices = @transform_5, window_bounds = array<i64: 1, 128>}, {transform_indices = @transform_6, window_bounds = array<i64: 1>}, {transform_indices = @transform_7, window_bounds = array<i64: 1, 8>}]} {
    %c0 = arith.constant 0 : index
    %c0_0 = arith.constant 0 : index
    %0 = vector.load %arg1[%c0, %c0_0] : memref<8x16xf32, #tpu.memory_space<vmem>>, vector<8x16xf32>
    %c0_1 = arith.constant 0 : index
    %c0_2 = arith.constant 0 : index
    %1 = vector.load %arg3[%c0_1, %c0_2] : memref<16x128xf32, #tpu.memory_space<vmem>>, vector<16x128xf32>
    %cst = arith.constant dense<0.000000e+00> : vector<8x128xf32>
    %2 = tpu.matmul %0, %1, %cst {dimension_numbers = #tpu.dot_dimension_numbers<[1], [0], [0], [1], [0, 0, 1, 1], [], []>} : vector<8x16xf32>, vector<16x128xf32>, vector<8x128xf32> -> vector<8x128xf32>
    %c0_3 = arith.constant 0 : index
    %c0_4 = arith.constant 0 : index
    %3 = vector.load %arg2[%c0_3, %c0_4] : memref<8x8xf32, #tpu.memory_space<vmem>>, vector<8x8xf32>
    %c0_5 = arith.constant 0 : index
    %c0_6 = arith.constant 0 : index
    %4 = vector.load %arg4[%c0_5, %c0_6] : memref<8x128xf32, #tpu.memory_space<vmem>>, vector<8x128xf32>
    %cst_7 = arith.constant dense<0.000000e+00> : vector<8x128xf32>
    %5 = tpu.matmul %3, %4, %cst_7 {dimension_numbers = #tpu.dot_dimension_numbers<[1], [0], [0], [1], [0, 0, 1, 1], [], []>} : vector<8x8xf32>, vector<8x128xf32>, vector<8x128xf32> -> vector<8x128xf32>
    %6 = arith.addf %2, %5 : vector<8x128xf32>
    %c0_8 = arith.constant 0 : index
    %c0_9 = arith.constant 0 : index
    %7 = vector.load %arg5[%c0_8, %c0_9] : memref<1x128xf32, #tpu.memory_space<vmem>>, vector<1x128xf32>
    %8 = vector.broadcast %7 : vector<1x128xf32> to vector<8x128xf32>
    %9 = arith.addf %6, %8 : vector<8x128xf32>
    %cst_10 = arith.constant 0.000000e+00 : f32
    %10 = vector.broadcast %cst_10 : f32 to vector<8x128xf32>
    %11 = arith.maximumf %9, %10 : vector<8x128xf32>
    %c0_11 = arith.constant 0 : index
    %c0_12 = arith.constant 0 : index
    %12 = vector.load %arg6[%c0_11, %c0_12] : memref<1x128xf32, #tpu.memory_space<vmem>>, vector<1x128xf32>
    %cst_13 = arith.constant dense<0.000000e+00> : vector<1x8xf32>
    %13 = tpu.matmul %12, %11, %cst_13 {dimension_numbers = #tpu.dot_dimension_numbers<[1], [1], [0], [0], [0, 0, 1, 0], [], []>} : vector<1x128xf32>, vector<8x128xf32>, vector<1x8xf32> -> vector<1x8xf32>
    %c0_14 = arith.constant 0 : index
    %14 = memref.load %arg7[%c0_14] : memref<1xf32, #tpu.memory_space<smem>>
    %15 = vector.broadcast %14 : f32 to vector<1x8xf32>
    %16 = arith.addf %13, %15 : vector<1x8xf32>
    %17 = arith.negf %16 : vector<1x8xf32>
    %18 = math.exp %17 : vector<1x8xf32>
    %cst_15 = arith.constant 1.000000e+00 : f32
    %19 = vector.broadcast %cst_15 : f32 to vector<1x8xf32>
    %20 = arith.addf %19, %18 : vector<1x8xf32>
    %21 = arith.divf %19, %20 : vector<1x8xf32>
    %c0_16 = arith.constant 0 : index
    %c0_17 = arith.constant 0 : index
    %22 = vector.load %arg8[%c0_16, %c0_17] : memref<1x8xf32, #tpu.memory_space<vmem>>, vector<1x8xf32>
    tpu.vector_store %arg8[%c0_16, %c0_17], %21 {strides = array<i32>} : memref<1x8xf32, #tpu.memory_space<vmem>>, vector<1x8xf32>,
    return
  }
  func.func @transform_0(%arg0: i32) -> (i32, i32) {
    %c0_i32 = arith.constant 0 : i32
    %c0_i32_0 = arith.constant 0 : i32
    return %arg0, %c0_i32 : i32, i32
  }
  func.func @transform_1(%arg0: i32) -> (i32, i32) {
    %c0_i32 = arith.constant 0 : i32
    %c0_i32_0 = arith.constant 0 : i32
    return %arg0, %c0_i32 : i32, i32
  }
  func.func @transform_2(%arg0: i32) -> (i32, i32) {
    %c0_i32 = arith.constant 0 : i32
    %c0_i32_0 = arith.constant 0 : i32
    %c0_i32_1 = arith.constant 0 : i32
    return %c0_i32, %c0_i32_0 : i32, i32
  }
  func.func @transform_3(%arg0: i32) -> (i32, i32) {
    %c0_i32 = arith.constant 0 : i32
    %c0_i32_0 = arith.constant 0 : i32
    %c0_i32_1 = arith.constant 0 : i32
    return %c0_i32, %c0_i32_0 : i32, i32
  }
  func.func @transform_4(%arg0: i32) -> (i32, i32) {
    %c0_i32 = arith.constant 0 : i32
    %c0_i32_0 = arith.constant 0 : i32
    %c0_i32_1 = arith.constant 0 : i32
    return %c0_i32, %c0_i32_0 : i32, i32
  }
  func.func @transform_5(%arg0: i32) -> (i32, i32) {
    %c0_i32 = arith.constant 0 : i32
    %c0_i32_0 = arith.constant 0 : i32
    %c0_i32_1 = arith.constant 0 : i32
    return %c0_i32, %c0_i32_0 : i32, i32
  }
  func.func @transform_6(%arg0: i32) -> i32 {
    %c0_i32 = arith.constant 0 : i32
    %c0_i32_0 = arith.constant 0 : i32
    return %c0_i32 : i32
  }
  func.func @transform_7(%arg0: i32) -> (i32, i32) {
    %c0_i32 = arith.constant 0 : i32
    %c0_i32_0 = arith.constant 0 : i32
    return %arg0, %c0_i32 : i32, i32
  }
}

</mosaic_0001>

<bundles_post_ra>
// kernel: tpu_custom_call.1
= control target key start
LH: loop header
LB: loop body
LE: loop exit
PB: predicated region body
PF: predicated region fallthrough
CT: control target
= control target key end

     0   :  { %13 = vsyncpa [#allocation4], 0  ;;  %s571_s0 = inlined_call_operand.hbm [shape: f32[8,16], index: 0, kind: input, shape index: {}]   ;;  %s572_s1 = inlined_call_operand.hbm [shape: f32[8,8], index: 1, kind: input, shape index: {}]   ;;  %s573_s2 = inlined_call_operand.hbm [shape: f32[16,128], index: 2, kind: input, shape index: {}]   ;;  %s574_s3 = inlined_call_operand.vmem [shape: f32[8,128], index: 3, kind: input, shape index: {}]   ;;  %s575_s4 = inlined_call_operand.vmem [shape: f32[1,128], index: 4, kind: input, shape index: {}]   ;;  %s576_s5 = inlined_call_operand.vmem [shape: f32[1,128], index: 5, kind: input, shape index: {}]   ;;  %s577_s6 = inlined_call_operand.<no memory space> [shape: f32[1], index: 6, kind: input, shape index: {}]   ;;  %s578_s7 = inlined_call_operand.hbm [shape: f32[1,8], index: 7, kind: output, shape index: {}]  }
   0x1   :  { %14 = vsyncpa [#allocation7], 0 }
   0x2   :  { %15 = vsyncpa [#allocation5], 0  ;;  %s462_s24 = smov [#allocation6]   ;;  %s463_s26 = smov [#allocation3]  }
   0x3   :  { %s32_s25 = sshll.u32 %s462_s24, 4  ;;  %s22_s27 = sshll.u32 %s463_s26, 4  ;;  %s33_s25 = int_to_ptr.vmem [resolvable:$true] %s32_s25  ;;  %s23_s27 = int_to_ptr.vmem [resolvable:$true] %s22_s27 }
   0x4   :  { %s368_s30 = scalar_lea.hbm %s572_s1, 128 }
   0x5   :  { %p369_p0 = scmp.ne.s32.totalorder %s572_s1, %s368_s30  ;;  %p372_p1 = scmp.lt.u32.totalorder %s368_s30, %s572_s1 }
   0x7   :  { %p374_p2 = pnand %p372_p1, %p369_p0 }
   0x9   :  { %377 = shalt.err (!%p374_p2)
}
   0xa   :  { %s378_s12 = scalar_lea.vmem %s33_s25, 128  ;;  %p383_p4 = scmp.lt.s32.totalorder %s33_s25, %s33_s25 }
   0xb   :  { %p379_p3 = scmp.ne.s32.totalorder %s33_s25, %s378_s12  ;;  %p384_p5 = scmp.lt.s32.totalorder %s378_s12, %s378_s12 }
   0xd   :  { %p385_p6 = por %p384_p5, %p383_p4 }
   0xf   :  { %p386_p7 = pnand %p385_p6, %p379_p3 }
  0x11   :  { %389 = shalt.err (!%p386_p7)
}
  0x12   :  { %35 = dma.hbm_to_vmem [thread:$0]  %s572_s1, 128, %s33_s25, [#allocation7]  }
  0x13   :  { %s390_s17 = scalar_lea.hbm %s571_s0, 128 }
  0x14   :  { %p391_p8 = scmp.ne.s32.totalorder %s571_s0, %s390_s17  ;;  %p394_p9 = scmp.lt.u32.totalorder %s390_s17, %s571_s0 }
  0x16   :  { %p396_p10 = pnand %p394_p9, %p391_p8 }
  0x18   :  { %399 = shalt.err (!%p396_p10)
}
  0x19   :  { %s400_s22 = scalar_lea.vmem %s23_s27, 128  ;;  %p405_p12 = scmp.lt.s32.totalorder %s23_s27, %s23_s27 }
  0x1a   :  { %p401_p11 = scmp.ne.s32.totalorder %s23_s27, %s400_s22  ;;  %p406_p13 = scmp.lt.s32.totalorder %s400_s22, %s400_s22 }
  0x1c   :  { %p407_p0 = por %p406_p13, %p405_p12 }
  0x1e   :  { %p408_p1 = pnand %p407_p0, %p401_p11 }
  0x20   :  { %411 = shalt.err (!%p408_p1)
}
  0x21   :  { %25 = dma.hbm_to_vmem [thread:$0]  %s571_s0, 128, %s23_s27, [#allocation4]  }
  0x22   :  { %s464_s24 = smov [#allocation8]   ;;  %s412_s29 = scalar_lea.hbm %s573_s2, 256 }
  0x23   :  { %s41_s25 = sshll.u32 %s464_s24, 4  ;;  %p413_p2 = scmp.ne.s32.totalorder %s573_s2, %s412_s29  ;;  %s42_s25 = int_to_ptr.vmem [resolvable:$true] %s41_s25 }
  0x24   :  { %p416_p3 = scmp.lt.u32.totalorder %s412_s29, %s573_s2 }
  0x26   :  { %p418_p4 = pnand %p416_p3, %p413_p2 }
  0x28   :  { %421 = shalt.err (!%p418_p4)
}
  0x29   :  { %s422_s11 = scalar_lea.vmem %s42_s25, 256  ;;  %p427_p6 = scmp.lt.s32.totalorder %s42_s25, %s42_s25 }
  0x2a   :  { %p423_p5 = scmp.ne.s32.totalorder %s42_s25, %s422_s11  ;;  %p428_p7 = scmp.lt.s32.totalorder %s422_s11, %s422_s11 }
  0x2c   :  { %p429_p8 = por %p428_p7, %p427_p6 }
  0x2e   :  { %p430_p9 = pnand %p429_p8, %p423_p5 }
  0x30   :  { %433 = shalt.err (!%p430_p9)
}
  0x31   :  { %s465_s0 = smov 128   ;;  %s466_s27 = smov 8  }
  0x32   :  { %47 = dma.hbm_to_vmem [thread:$0]  %s573_s2, 256, %s42_s25, [#allocation7], %s465_s0, %s465_s0, %s466_s27  }
  0x33   :  { %456 = dma.done.wait [#allocation4], 128  }
  0x34   :  { %457 = vsyncadd [#allocation4], 4294967168 }
  0x35   :  { %458 = dma.done.wait [#allocation7], 384  }
  0x36   :  { %459 = vsyncadd [#allocation7], 4294966912  ;;  %v467_v0 = vmov 0.0|0.0   ;;  %v468_v1 = vmov 0.0   ;;  %vm469_vm0 = vmmov 0   ;;  %vm70_vm1 = vcmask 64512  }
  0x37   :  { %352 = vmatprep.subr.bf16.mxu1 %v467_v0  ;;  %335 = vmatprep.subr.mxu0 %v468_v1  ;;  %v66_v2 = vld [vmem:[#allocation8] sm:$0xff]  ;;  %v67_v3 = vld [vmem:[#allocation8 + $0x8] sm:$0xff]  ;;  %v69_v4 = vld [vmem:[%s574_s3] sm:$0xff]  ;;  %vm144_vm2 = vcmask 130048   ;;  %v229_v17 = vstv %s577_s6  ;;  %vm306_vm3 = vcmask 57344  }
  0x38   :  { %337 = vmatprep.mubr.msk.f32.mxu0 %vm469_vm0, %v468_v1  ;;  %344 = vmatprep.mubr.msk.f32.mxu1 %vm469_vm0, %v468_v1  ;;  %v353_v5 = vpack.c.bf16 %v67_v3, %v66_v2  ;;  %v68_v6 = vld [vmem:[#allocation6] sm:$0xff]  ;;  %v65_v7 = vld [vmem:[#allocation3] sm:$0xff] }
  0x39   :  { %336 = vmatpush3.msra.mxu0 %v69_v4  ;;  %v326_v11 = vld [vmem:[%s575_s4] ss:$0 sm:$0xff]  ;;  %s470_s4 = smov [#allocation9]  }
  0x3a   :  { %338 = vmatmul.mubr.msk.f32.vlgmr.msra.gmra.mrb[0].mxu0 %vm70_vm1, %v68_v6  ;;  %347 = vmatprep.subr.mxu0 %v468_v1  ;;  %v227_v16 = vld [vmem:[%s576_s5] sm:$0x1]  ;;  %s314_s20 = sshll.u32 %s470_s4, 4  ;;  %s315_s20 = int_to_ptr.vmem [resolvable:$true] %s314_s20 }
  0x3b   :  { %354 = vmatpush3.bf16.msra.mxu1 %v353_v5  ;;  %349 = vmatprep.mubr.msk.f32.mxu0 %vm469_vm0, %v468_v1  ;;  %s434_s5 = scalar_lea.vmem %s315_s20, 16  ;;  %s438_s21 = scalar_lea.vmem %s315_s20, 32 }
  0x3c   :  { %p435_p10 = scmp.ne.s32.totalorder %s315_s20, %s434_s5  ;;  %p439_p11 = scmp.lt.s32.totalorder %s315_s20, %s315_s20 }
  0x3d   :  { %p440_p12 = scmp.lt.s32.totalorder %s438_s21, %s434_s5 }
  0x3e   :  { %345 = vmatmul.mubr.msk.f32.vlgmr.msra.gmra.mrb[0].mxu1 %vm144_vm2, %v65_v7 }
  0x3f   :  { %p441_p13 = por %p440_p12, %p439_p11 }
  0x41   :  { %p442_p0 = pnand %p441_p13, %p435_p10 }
 0x10d   :  { %v140_v8 = vpop.f32.mrb[0].mxu0 }
 0x10e   :  { %v339_v9 = vpop.f32.mrb[1].mxu0 }
 0x111   :  { %v214_v10 = vpop.f32.mrb[0].mxu1 }
 0x112   :  { %v215_v12 = vadd.f32 %v214_v10, %v140_v8  ;;  %v346_v13 = vpop.f32.mrb[1].mxu1 }
 0x114   :  { %v225_v14 = vadd.f32 %v326_v11, %v215_v12 }
 0x116   :  { %v226_v15 = vmax.f32 %v225_v14, 0.0 }
 0x118   :  { %348 = vmatpush3.xpose.msra.mxu0 %v226_v15 }
 0x11b   :  { %350 = vmatmul.mubr.f32.vlgmr.msra.gmra.mrb[2].mxu0 %v227_v16 }
 0x1ee   :  { %v296_v18 = vpop.f32.mrb[2].mxu0 }
 0x1ef   :  { %v297_v19 = vadd.f32 %v296_v18, %v229_v17  ;;  %v351_v20 = vpop.f32.mrb[3].mxu0 }
 0x1f1   :  { %v327_v21 = vmul.f32 -1.442695, %v297_v19 }
 0x1f3   :  { %364 = vpow2.f32 %v327_v21 }
 0x1fd   :  { %v365_v22 = vpop.eup %364 }
 0x1fe   :  { %v303_v23 = vadd.f32 1.0, %v365_v22 }
 0x200   :  { %366 = vrcp.f32 %v303_v23 }
 0x20a   :  { %v367_v24 = vpop.eup %366 }
 0x20b   :  { %307 = vst.msk [vmem:[#allocation9] sm:$0x1] %vm306_vm3, %v367_v24 }
 0x20c   :  { %445 = shalt.err (!%p442_p0)
}
 0x20d   :  { %s446_s1 = scalar_lea.hbm %s578_s7, 16 }
 0x20e   :  { %p447_p1 = scmp.ne.s32.totalorder %s578_s7, %s446_s1  ;;  %p450_p2 = scmp.lt.u32.totalorder %s446_s1, %s578_s7 }
 0x210   :  { %p452_p3 = pnand %p450_p2, %p447_p1 }
 0x212   :  { %455 = shalt.err (!%p452_p3)
}
 0x213   :  { %317 = dma.vmem_to_hbm [thread:$0]  %s315_s20, 16, %s578_s7, [#allocation5]  }
 0x214   :  { %460 = dma.done.wait [#allocation5], 16  }
 0x215   :  { %461 = vsyncadd [#allocation5], 4294967280 }
 0x216   :  { %321 = vsyncpa [#allocation4], 1 }
 0x217   :  { %322 = vsyncpa [#allocation7], 1 }
 0x218   :  { %323 = vsyncpa [#allocation5], 1 }

</bundles_post_ra>
